<compile_context>
chip_gen: v6e
topology: v6e:2x2x1
jax: 0.10.0
libtpu: 0.0.40
codegen_flags: <defaults>
</compile_context>

<pallas_src>
import numpy as np
import jax
import jax.numpy as jnp
from jax import lax
from jax.experimental import pallas as pl
from jax.experimental.pallas import tpu as pltpu

_LOG_2PI = float(np.log(2.0 * np.pi))


def _actor_kernel(obs_ref, act_ref,
                  w1_ref, b1_ref, w2_ref, b2_ref, w3_ref, b3_ref,
                  log_std_ref,
                  mu_ref, logp_ref):
    obs = obs_ref[...]                                            # [TB, obs_dim]

    # mu_net: Linear -> tanh -> Linear -> tanh -> Linear (identity output act)
    h = jnp.tanh(jnp.dot(obs, w1_ref[...],
                         preferred_element_type=jnp.float32) + b1_ref[...])
    h = jnp.tanh(jnp.dot(h, w2_ref[...],
                         preferred_element_type=jnp.float32) + b2_ref[...])
    mu = jnp.dot(h, w3_ref[...],
                 preferred_element_type=jnp.float32) + b3_ref[...]  # [TB, act_dim]
    mu_ref[...] = mu

    # gaussian_likelihood(act, mu, log_std)
    #   pre = -0.5 * (((act - mu) / (exp(log_std) + eps))^2 + 2*log_std + log(2*pi))
    # log_std-only terms are hoisted: per-element work is one sub + one mul + fma.
    log_std = log_std_ref[...]                                    # [1, act_dim]
    eps = jnp.float32(1e-8)
    inv_std = 1.0 / (jnp.exp(log_std) + eps)                      # [1, act_dim]
    const = -0.5 * (2.0 * log_std + jnp.float32(_LOG_2PI))        # [1, act_dim]

    z = (act_ref[...] - mu) * inv_std                             # [TB, act_dim]
    pre = -0.5 * (z * z) + const                                  # [TB, act_dim]

    # Reduce over the action axis via a 1 x act_dim matmul so the result is
    # produced lane-dense as [1, TB] (no sublane->lane relayout needed).
    ones_row = jnp.ones((1, pre.shape[-1]), jnp.float32)
    logp_ref[...] = lax.dot_general(
        ones_row, pre,
        dimension_numbers=(((1,), (1,)), ((), ())),
        preferred_element_type=jnp.float32)                       # [1, TB]


def _choose_tile_b(batch, max_tile=512):
    """Batch tile: as large as reasonable (<=512), multiple of 8 (f32 sublane)."""
    if batch >= max_tile:
        return max_tile
    return max(8, ((batch + 7) // 8) * 8)


def mlp_gaussian_actor_forward(obs, act, params, tile_b=None):
    """Returns (mu, log_std, logp_a) -- mu/log_std define the pi distribution."""
    w1, b1, w2, b2, w3, b3, log_std = params
    B, obs_dim = obs.shape
    act_dim = w3.shape[1]
    h1 = w1.shape[1]
    h2 = w2.shape[1]

    if tile_b is None:
        tile_b = _choose_tile_b(B)
    num_tiles = pl.cdiv(B, tile_b)
    b_pad = num_tiles * tile_b

    # Pad the batch so every grid step gets a full tile (padded rows are
    # computed on zeros and sliced off below).
    if b_pad != B:
        pad = b_pad - B
        obs = jnp.pad(obs, ((0, pad), (0, 0)))
        act = jnp.pad(act, ((0, pad), (0, 0)))

    # Weights / biases / log_std: constant block index -> VMEM-resident.
    def resident(shape):
        return pl.BlockSpec(shape, lambda i: (0,) * len(shape))

    cost = pl.CostEstimate(
        flops=2 * b_pad * (obs_dim * h1 + h1 * h2 + h2 * act_dim)
              + 6 * b_pad * act_dim,
        transcendentals=b_pad * (h1 + h2) + act_dim,
        bytes_accessed=4 * (b_pad * (obs_dim + 2 * act_dim + 1)
                            + w1.size + b1.size + w2.size + b2.size
                            + w3.size + b3.size + log_std.size),
    )

    mu_pad, logp_pad = pl.pallas_call(
        _actor_kernel,
        out_shape=(
            jax.ShapeDtypeStruct((b_pad, act_dim), jnp.float32),
            jax.ShapeDtypeStruct((num_tiles, tile_b), jnp.float32),  # lane-dense logp
        ),
        grid=(num_tiles,),
        in_specs=[
            pl.BlockSpec((tile_b, obs_dim), lambda i: (i, 0)),   # obs (streamed)
            pl.BlockSpec((tile_b, act_dim), lambda i: (i, 0)),   # act (streamed)
            resident(w1.shape), resident(b1.shape),
            resident(w2.shape), resident(b2.shape),
            resident(w3.shape), resident(b3.shape),
            resident(log_std.shape),
        ],
        out_specs=(
            pl.BlockSpec((tile_b, act_dim), lambda i: (i, 0)),
            pl.BlockSpec((1, tile_b), lambda i: (i, 0)),
        ),
        compiler_params=pltpu.CompilerParams(
            dimension_semantics=("parallel",)),   # megacore sharding on v7x
        cost_estimate=cost,
    )(obs, act, w1, b1, w2, b2, w3, b3, log_std)

    mu = mu_pad[:B]
    logp = logp_pad.reshape(-1)[:B]
    return mu, log_std[0], logp


def init_params(key, obs_dim, hidden_sizes, act_dim):
    """Deterministic synthetic parameters (shapes match create_mlp + log_std)."""
    sizes = [obs_dim] + list(hidden_sizes) + [act_dim]
    params = []
    for j in range(len(sizes) - 1):
        key, kw = jax.random.split(key)
        bound = 1.0 / np.sqrt(sizes[j])
        w = jax.random.uniform(kw, (sizes[j], sizes[j + 1]),
                               jnp.float32, -bound, bound)
        b = jnp.zeros((1, sizes[j + 1]), jnp.float32)
        params += [w, b]
    log_std = jnp.full((1, act_dim), -0.5, jnp.float32)   # -0.5 * ones(act_dim)
    return tuple(params) + (log_std,)


def reference_forward(obs, act, params):
    w1, b1, w2, b2, w3, b3, log_std = params
    h = jnp.tanh(obs @ w1 + b1)
    h = jnp.tanh(h @ w2 + b2)
    mu = h @ w3 + b3
    eps = 1e-8
    z = (act - mu) / (jnp.exp(log_std) + eps)
    pre = -0.5 * (z ** 2 + 2.0 * log_std + _LOG_2PI)
    return mu, pre.sum(axis=-1)


def _check(batch, obs_dim, hidden_sizes, act_dim, tile_b, seed):
    key = jax.random.PRNGKey(seed)
    kobs, kact, kparams = jax.random.split(key, 3)
    obs = jax.random.normal(kobs, (batch, obs_dim), jnp.float32)
    act = jax.random.normal(kact, (batch, act_dim), jnp.float32)
    params = init_params(kparams, obs_dim, hidden_sizes, act_dim)

    mu, log_std, logp_a = mlp_gaussian_actor_forward(obs, act, params,
                                                     tile_b=tile_b)
    jax.block_until_ready((mu, log_std, logp_a))

    mu_ref, logp_ref = reference_forward(obs, act, params)
    np.testing.assert_allclose(np.asarray(mu), np.asarray(mu_ref),
                               rtol=1e-5, atol=1e-5)
    np.testing.assert_allclose(np.asarray(logp_a), np.asarray(logp_ref),
                               rtol=1e-5, atol=1e-5)
    np.testing.assert_allclose(np.asarray(log_std),
                               np.asarray(params[-1][0]), rtol=0, atol=0)


if __name__ == "__main__":
    # Small primary test (single tile).
    _check(batch=8, obs_dim=16, hidden_sizes=(32, 32), act_dim=8,
           tile_b=None, seed=0)
    # Multi-tile + padded-last-tile path (batch not a multiple of the tile).
    _check(batch=150, obs_dim=16, hidden_sizes=(32, 32), act_dim=8,
           tile_b=64, seed=0)

    # pi is DiagonalGaussianDistribution(mu, log_std); sampling uses host RNG,
    # so it stays outside the kernel (only deterministic math is in Pallas).
    print("KERNEL_OK")
</pallas_src>

<mosaic_0001>
module attributes {stable_mosaic.version = 11 : i64} {
  func.func @_actor_kernel(%arg0: i32, %arg1: memref<8x16xf32, #tpu.memory_space<vmem>>, %arg2: memref<8x8xf32, #tpu.memory_space<vmem>>, %arg3: memref<16x32xf32, #tpu.memory_space<vmem>>, %arg4: memref<1x32xf32, #tpu.memory_space<vmem>>, %arg5: memref<32x32xf32, #tpu.memory_space<vmem>>, %arg6: memref<1x32xf32, #tpu.memory_space<vmem>>, %arg7: memref<32x8xf32, #tpu.memory_space<vmem>>, %arg8: memref<1x8xf32, #tpu.memory_space<vmem>>, %arg9: memref<1x8xf32, #tpu.memory_space<vmem>>, %arg10: memref<8x8xf32, #tpu.memory_space<vmem>>, %arg11: memref<1x8xf32, #tpu.memory_space<vmem>>) attributes {dimension_semantics = [#tpu.dimension_semantics<parallel>], iteration_bounds = array<i64: 1>, scalar_prefetch = 0 : i64, scratch_operands = 0 : i64, tpu.core_type = #tpu.core_type<tc>, window_params = [{transform_indices = @transform_0, window_bounds = array<i64: 8, 16>}, {transform_indices = @transform_1, window_bounds = array<i64: 8, 8>}, {pipeline_mode = #tpu.pipeline_mode<synchronous>, transform_indices = @transform_2, window_bounds = array<i64: 16, 32>}, {pipeline_mode = #tpu.pipeline_mode<synchronous>, transform_indices = @transform_3, window_bounds = array<i64: 1, 32>}, {pipeline_mode = #tpu.pipeline_mode<synchronous>, transform_indices = @transform_4, window_bounds = array<i64: 32, 32>}, {pipeline_mode = #tpu.pipeline_mode<synchronous>, transform_indices = @transform_5, window_bounds = array<i64: 1, 32>}, {pipeline_mode = #tpu.pipeline_mode<synchronous>, transform_indices = @transform_6, window_bounds = array<i64: 32, 8>}, {pipeline_mode = #tpu.pipeline_mode<synchronous>, transform_indices = @transform_7, window_bounds = array<i64: 1, 8>}, {pipeline_mode = #tpu.pipeline_mode<synchronous>, transform_indices = @transform_8, window_bounds = array<i64: 1, 8>}, {transform_indices = @transform_9, window_bounds = array<i64: 8, 8>}, {transform_indices = @transform_10, window_bounds = array<i64: 1, 8>}]} {
    %c0 = arith.constant 0 : index
    %c0_0 = arith.constant 0 : index
    %0 = vector.load %arg1[%c0, %c0_0] : memref<8x16xf32, #tpu.memory_space<vmem>>, vector<8x16xf32>
    %c0_1 = arith.constant 0 : index
    %c0_2 = arith.constant 0 : index
    %1 = vector.load %arg3[%c0_1, %c0_2] : memref<16x32xf32, #tpu.memory_space<vmem>>, vector<16x32xf32>
    %cst = arith.constant dense<0.000000e+00> : vector<8x32xf32>
    %2 = tpu.matmul %0, %1, %cst {dimension_numbers = #tpu.dot_dimension_numbers<[1], [0], [0], [1], [0, 0, 1, 1], [], []>} : vector<8x16xf32>, vector<16x32xf32>, vector<8x32xf32> -> vector<8x32xf32>
    %c0_3 = arith.constant 0 : index
    %c0_4 = arith.constant 0 : index
    %3 = vector.load %arg4[%c0_3, %c0_4] : memref<1x32xf32, #tpu.memory_space<vmem>>, vector<1x32xf32>
    %4 = vector.broadcast %3 : vector<1x32xf32> to vector<8x32xf32>
    %5 = arith.addf %2, %4 : vector<8x32xf32>
    %6 = math.tanh %5 : vector<8x32xf32>
    %c0_5 = arith.constant 0 : index
    %c0_6 = arith.constant 0 : index
    %7 = vector.load %arg5[%c0_5, %c0_6] : memref<32x32xf32, #tpu.memory_space<vmem>>, vector<32x32xf32>
    %cst_7 = arith.constant dense<0.000000e+00> : vector<8x32xf32>
    %8 = tpu.matmul %6, %7, %cst_7 {dimension_numbers = #tpu.dot_dimension_numbers<[1], [0], [0], [1], [0, 0, 1, 1], [], []>} : vector<8x32xf32>, vector<32x32xf32>, vector<8x32xf32> -> vector<8x32xf32>
    %c0_8 = arith.constant 0 : index
    %c0_9 = arith.constant 0 : index
    %9 = vector.load %arg6[%c0_8, %c0_9] : memref<1x32xf32, #tpu.memory_space<vmem>>, vector<1x32xf32>
    %10 = vector.broadcast %9 : vector<1x32xf32> to vector<8x32xf32>
    %11 = arith.addf %8, %10 : vector<8x32xf32>
    %12 = math.tanh %11 : vector<8x32xf32>
    %c0_10 = arith.constant 0 : index
    %c0_11 = arith.constant 0 : index
    %13 = vector.load %arg7[%c0_10, %c0_11] : memref<32x8xf32, #tpu.memory_space<vmem>>, vector<32x8xf32>
    %cst_12 = arith.constant dense<0.000000e+00> : vector<8x8xf32>
    %14 = tpu.matmul %12, %13, %cst_12 {dimension_numbers = #tpu.dot_dimension_numbers<[1], [0], [0], [1], [0, 0, 1, 1], [], []>} : vector<8x32xf32>, vector<32x8xf32>, vector<8x8xf32> -> vector<8x8xf32>
    %c0_13 = arith.constant 0 : index
    %c0_14 = arith.constant 0 : index
    %15 = vector.load %arg8[%c0_13, %c0_14] : memref<1x8xf32, #tpu.memory_space<vmem>>, vector<1x8xf32>
    %16 = vector.broadcast %15 : vector<1x8xf32> to vector<8x8xf32>
    %17 = arith.addf %14, %16 : vector<8x8xf32>
    %c0_15 = arith.constant 0 : index
    %c0_16 = arith.constant 0 : index
    %18 = vector.load %arg10[%c0_15, %c0_16] : memref<8x8xf32, #tpu.memory_space<vmem>>, vector<8x8xf32>
    tpu.vector_store %arg10[%c0_15, %c0_16], %17 {strides = array<i32>} : memref<8x8xf32, #tpu.memory_space<vmem>>, vector<8x8xf32>,
    %c0_17 = arith.constant 0 : index
    %c0_18 = arith.constant 0 : index
    %19 = vector.load %arg9[%c0_17, %c0_18] : memref<1x8xf32, #tpu.memory_space<vmem>>, vector<1x8xf32>
    %20 = math.exp %19 : vector<1x8xf32>
    %cst_19 = arith.constant 9.99999993E-9 : f32
    %21 = vector.broadcast %cst_19 : f32 to vector<1x8xf32>
    %22 = arith.addf %20, %21 : vector<1x8xf32>
    %cst_20 = arith.constant 1.000000e+00 : f32
    %23 = vector.broadcast %cst_20 : f32 to vector<1x8xf32>
    %24 = arith.divf %23, %22 : vector<1x8xf32>
    %cst_21 = arith.constant 2.000000e+00 : f32
    %25 = vector.broadcast %cst_21 : f32 to vector<1x8xf32>
    %26 = arith.mulf %25, %19 : vector<1x8xf32>
    %cst_22 = arith.constant 1.83787704 : f32
    %27 = vector.broadcast %cst_22 : f32 to vector<1x8xf32>
    %28 = arith.addf %26, %27 : vector<1x8xf32>
    %cst_23 = arith.constant -5.000000e-01 : f32
    %29 = vector.broadcast %cst_23 : f32 to vector<1x8xf32>
    %30 = arith.mulf %29, %28 : vector<1x8xf32>
    %c0_24 = arith.constant 0 : index
    %c0_25 = arith.constant 0 : index
    %31 = vector.load %arg2[%c0_24, %c0_25] : memref<8x8xf32, #tpu.memory_space<vmem>>, vector<8x8xf32>
    %32 = arith.subf %31, %17 : vector<8x8xf32>
    %33 = vector.broadcast %24 : vector<1x8xf32> to vector<8x8xf32>
    %34 = arith.mulf %32, %33 : vector<8x8xf32>
    %35 = arith.mulf %34, %34 : vector<8x8xf32>
    %cst_26 = arith.constant -5.000000e-01 : f32
    %36 = vector.broadcast %cst_26 : f32 to vector<8x8xf32>
    %37 = arith.mulf %36, %35 : vector<8x8xf32>
    %38 = vector.broadcast %30 : vector<1x8xf32> to vector<8x8xf32>
    %39 = arith.addf %37, %38 : vector<8x8xf32>
    %cst_27 = arith.constant 1.000000e+00 : f32
    %40 = vector.broadcast %cst_27 : f32 to vector<1x8xf32>
    %cst_28 = arith.constant dense<0.000000e+00> : vector<1x8xf32>
    %41 = tpu.matmul %40, %39, %cst_28 {dimension_numbers = #tpu.dot_dimension_numbers<[1], [1], [0], [0], [0, 0, 1, 0], [], []>} : vector<1x8xf32>, vector<8x8xf32>, vector<1x8xf32> -> vector<1x8xf32>
    %c0_29 = arith.constant 0 : index
    %c0_30 = arith.constant 0 : index
    %42 = vector.load %arg11[%c0_29, %c0_30] : memref<1x8xf32, #tpu.memory_space<vmem>>, vector<1x8xf32>
    tpu.vector_store %arg11[%c0_29, %c0_30], %41 {strides = array<i32>} : memref<1x8xf32, #tpu.memory_space<vmem>>, vector<1x8xf32>,
    return
  }
  func.func @transform_0(%arg0: i32) -> (i32, i32) {
    %c0_i32 = arith.constant 0 : i32
    %c0_i32_0 = arith.constant 0 : i32
    return %arg0, %c0_i32 : i32, i32
  }
  func.func @transform_1(%arg0: i32) -> (i32, i32) {
    %c0_i32 = arith.constant 0 : i32
    %c0_i32_0 = arith.constant 0 : i32
    return %arg0, %c0_i32 : i32, i32
  }
  func.func @transform_2(%arg0: i32) -> (i32, i32) {
    %c0_i32 = arith.constant 0 : i32
    %c0_i32_0 = arith.constant 0 : i32
    %c0_i32_1 = arith.constant 0 : i32
    return %c0_i32, %c0_i32_0 : i32, i32
  }
  func.func @transform_3(%arg0: i32) -> (i32, i32) {
    %c0_i32 = arith.constant 0 : i32
    %c0_i32_0 = arith.constant 0 : i32
    %c0_i32_1 = arith.constant 0 : i32
    return %c0_i32, %c0_i32_0 : i32, i32
  }
  func.func @transform_4(%arg0: i32) -> (i32, i32) {
    %c0_i32 = arith.constant 0 : i32
    %c0_i32_0 = arith.constant 0 : i32
    %c0_i32_1 = arith.constant 0 : i32
    return %c0_i32, %c0_i32_0 : i32, i32
  }
  func.func @transform_5(%arg0: i32) -> (i32, i32) {
    %c0_i32 = arith.constant 0 : i32
    %c0_i32_0 = arith.constant 0 : i32
    %c0_i32_1 = arith.constant 0 : i32
    return %c0_i32, %c0_i32_0 : i32, i32
  }
  func.func @transform_6(%arg0: i32) -> (i32, i32) {
    %c0_i32 = arith.constant 0 : i32
    %c0_i32_0 = arith.constant 0 : i32
    %c0_i32_1 = arith.constant 0 : i32
    return %c0_i32, %c0_i32_0 : i32, i32
  }
  func.func @transform_7(%arg0: i32) -> (i32, i32) {
    %c0_i32 = arith.constant 0 : i32
    %c0_i32_0 = arith.constant 0 : i32
    %c0_i32_1 = arith.constant 0 : i32
    return %c0_i32, %c0_i32_0 : i32, i32
  }
  func.func @transform_8(%arg0: i32) -> (i32, i32) {
    %c0_i32 = arith.constant 0 : i32
    %c0_i32_0 = arith.constant 0 : i32
    %c0_i32_1 = arith.constant 0 : i32
    return %c0_i32, %c0_i32_0 : i32, i32
  }
  func.func @transform_9(%arg0: i32) -> (i32, i32) {
    %c0_i32 = arith.constant 0 : i32
    %c0_i32_0 = arith.constant 0 : i32
    return %arg0, %c0_i32 : i32, i32
  }
  func.func @transform_10(%arg0: i32) -> (i32, i32) {
    %c0_i32 = arith.constant 0 : i32
    %c0_i32_0 = arith.constant 0 : i32
    return %arg0, %c0_i32 : i32, i32
  }
}

</mosaic_0001>

<bundles_post_ra>
// kernel: tpu_custom_call.1
= control target key start
LH: loop header
LB: loop body
LE: loop exit
PB: predicated region body
PF: predicated region fallthrough
CT: control target
= control target key end

     0   :  { %16 = vsyncpa [#allocation3], 0  ;;  %s737_s0 = inlined_call_operand.vmem [shape: f32[8,16], index: 0, kind: input, shape index: {}]   ;;  %s738_s1 = inlined_call_operand.hbm [shape: f32[8,8], index: 1, kind: input, shape index: {}]   ;;  %s739_s2 = inlined_call_operand.hbm [shape: f32[16,32], index: 2, kind: input, shape index: {}]   ;;  %s740_s3 = inlined_call_operand.vmem [shape: f32[1,32], index: 3, kind: input, shape index: {}]   ;;  %s741_s4 = inlined_call_operand.vmem [shape: f32[32,32], index: 4, kind: input, shape index: {}]   ;;  %s742_s5 = inlined_call_operand.vmem [shape: f32[1,32], index: 5, kind: input, shape index: {}]   ;;  %s743_s6 = inlined_call_operand.vmem [shape: f32[32,8], index: 6, kind: input, shape index: {}]   ;;  %s744_s7 = inlined_call_operand.vmem [shape: f32[1,8], index: 7, kind: input, shape index: {}]   ;;  %s745_s8 = inlined_call_operand.vmem [shape: f32[1,8], index: 8, kind: input, shape index: {}]   ;;  %s746_s9 = inlined_call_operand.hbm [shape: f32[8,8], index: 9, kind: output, shape index: {0}]   ;;  %s747_s10 = inlined_call_operand.hbm [shape: f32[1,8], index: 10, kind: output, shape index: {1}]  }
   0x1   :  { %17 = vsyncpa [#allocation6], 0 }
   0x2   :  { %18 = vsyncpa [#allocation4], 0 }
   0x3   :  { %19 = vsyncpa [#allocation9], 0  ;;  %s616_s13 = smov [#allocation2]   ;;  %s617_s15 = smov [#allocation5]  }
   0x4   :  { %s28_s14 = sshll.u32 %s616_s13, 4  ;;  %s37_s16 = sshll.u32 %s617_s15, 4  ;;  %s29_s14 = int_to_ptr.vmem [resolvable:$true] %s28_s14  ;;  %s38_s16 = int_to_ptr.vmem [resolvable:$true] %s37_s16 }
   0x5   :  { %s536_s17 = scalar_lea.vmem %s29_s14, 128  ;;  %p541_p1 = scmp.lt.s32.totalorder %s29_s14, %s29_s14 }
   0x6   :  { %p537_p0 = scmp.ne.s32.totalorder %s29_s14, %s536_s17  ;;  %p542_p2 = scmp.lt.s32.totalorder %s536_s17, %s536_s17 }
   0x8   :  { %p543_p3 = por %p542_p2, %p541_p1 }
   0xa   :  { %p544_p4 = pnand %p543_p3, %p537_p0 }
   0xc   :  { %547 = shalt.err (!%p544_p4)
}
   0xd   :  { %31 = dma.hbm_to_vmem [thread:$0]  %s738_s1, 128, %s29_s14, [#allocation3]  }
   0xe   :  { %s556_s20 = scalar_lea.vmem %s38_s16, 256  ;;  %p561_p6 = scmp.lt.s32.totalorder %s38_s16, %s38_s16 }
   0xf   :  { %p557_p5 = scmp.ne.s32.totalorder %s38_s16, %s556_s20  ;;  %p562_p7 = scmp.lt.s32.totalorder %s556_s20, %s556_s20 }
  0x11   :  { %p563_p8 = por %p562_p7, %p561_p6 }
  0x13   :  { %p564_p9 = pnand %p563_p8, %p557_p5 }
  0x15   :  { %567 = shalt.err (!%p564_p9)
}
  0x16   :  { %s618_s21 = smov 128   ;;  %s619_s22 = smov 8  }
  0x17   :  { %43 = dma.hbm_to_vmem [thread:$0]  %s739_s2, 256, %s38_s16, [#allocation6], %s618_s21, %s618_s21, %s619_s22  }
  0x18   :  { %608 = dma.done.wait [#allocation3], 128  }
  0x19   :  { %609 = vsyncadd [#allocation3], 4294967168 }
  0x1a   :  { %610 = dma.done.wait [#allocation6], 256  }
  0x1b   :  { %611 = vsyncadd [#allocation6], 4294967040  ;;  %v620_v0 = vmov 0.0   ;;  %vm621_vm0 = vmmov 0   ;;  %v64_v1 = vld [vmem:[#allocation5 + $0x8] sm:$0xff]  ;;  %v63_v2 = vld [vmem:[#allocation5] sm:$0xff]  ;;  %v331_v26 = vlaneseq }
  0x1c   :  { %477 = vmatprep.subr.mxu0 %v620_v0  ;;  %481 = vmatprep.mubr.msk.f32.mxu0 %vm621_vm0, %v620_v0  ;;  %v62_v3 = vld [vmem:[%s737_s0] sm:$0xff]  ;;  %vm72_vm1 = vcmask 130048   ;;  %v150_v4 = vld [vmem:[%s741_s4 + $0x18] sm:$0xff]  ;;  %v149_v5 = vld [vmem:[%s741_s4 + $0x10] sm:$0xff]  ;;  %vm158_vm2 = vcmask 261120   ;;  %vm317_vm3 = vcmask 64512  }
  0x1d   :  { %484 = vmatprep.subr.mxu1 %v620_v0  ;;  %492 = vmatprep.mubr.msk.f32.mxu1 %vm621_vm0, %v620_v0  ;;  %v148_v6 = vld [vmem:[%s741_s4 + $0x8] sm:$0xff]  ;;  %v147_v7 = vld [vmem:[%s741_s4] sm:$0xff]  ;;  %v236_v13 = vld [vmem:[%s743_s6 + $0x18] sm:$0xff]  ;;  %v332_v27 = vshrl.u32 %v331_v26, 7  ;;  %v622_v45 = vmov 1.0  }
  0x1e   :  { %478 = vmatpush3.msra.mxu0 %v64_v1  ;;  %485 = vmatpush3.msra.mxu1 %v150_v4  ;;  %v454_v8 = vld [vmem:[%s740_s3] ss:$0 sm:$0xff]  ;;  %v235_v14 = vld [vmem:[%s743_s6 + $0x10] sm:$0xff]  ;;  %v234_v15 = vld [vmem:[%s743_s6 + $0x8] sm:$0xff] }
  0x1f   :  { %479 = vmatprep.subr.mxu0 %v620_v0  ;;  %486 = vmatprep.subr.mxu1 %v620_v0  ;;  %v233_v16 = vld [vmem:[%s743_s6] sm:$0xff]  ;;  %v333_v29 = vsub.s32 0, %v332_v27 }
  0x20   :  { %480 = vmatpush3.msra.mxu0 %v63_v2  ;;  %487 = vmatpush3.msra.mxu1 %v149_v5  ;;  %v456_v17 = vld [vmem:[%s742_s5] ss:$0 sm:$0xff] }
  0x21   :  { %482 = vmatmul.mubr.msk.f32.vlgmr.msra.gmra.mxu0 %vm72_vm1, %v62_v3  ;;  %495 = vmatprep.subr.mxu0 %v620_v0  ;;  %v319_v22 = vld [vmem:[%s745_s8] sm:$0x1]  ;;  %s623_s8 = smov [#allocation7]  }
  0x22   :  { %503 = vmatprep.mubr.msk.f32.mxu0 %vm621_vm0, %v620_v0  ;;  %488 = vmatprep.subr.mxu1 %v620_v0  ;;  %v320_v23 = vmul.f32 1.442695, %v319_v22  ;;  %v325_v28 = vmul.f32 2.0, %v319_v22  ;;  %v458_v31 = vld [vmem:[%s744_s7] ss:$0 sm:$0xff]  ;;  %s430_s7 = sshll.u32 %s623_s8, 4  ;;  %s431_s7 = int_to_ptr.vmem [resolvable:$true] %s430_s7 }
  0x23   :  { %489 = vmatpush3.msra.mxu1 %v148_v6  ;;  %496 = vmatpush3.msra.mxu0 %v236_v13  ;;  %v328_v34 = vld [vmem:[#allocation2] sm:$0xff]  ;;  %s568_s24 = scalar_lea.vmem %s431_s7, 128  ;;  %p573_p11 = scmp.lt.s32.totalorder %s431_s7, %s431_s7 }
  0x24   :  { %490 = vmatprep.subr.mxu1 %v620_v0  ;;  %497 = vmatprep.subr.mxu0 %v620_v0  ;;  %v326_v32 = vadd.f32 1.837877, %v325_v28  ;;  %p569_p10 = scmp.ne.s32.totalorder %s431_s7, %s568_s24  ;;  %p574_p12 = scmp.lt.s32.totalorder %s568_s24, %s568_s24 }
  0x25   :  { %491 = vmatpush3.msra.mxu1 %v147_v7  ;;  %498 = vmatpush3.msra.mxu0 %v235_v14 }
  0x26   :  { %506 = vmatprep.subr.mxu1 %v620_v0  ;;  %499 = vmatprep.subr.mxu0 %v620_v0  ;;  %v327_v38 = vmul.f32 -0.5, %v326_v32  ;;  %p575_p13 = por %p574_p12, %p573_p11 }
  0x27   :  { %500 = vmatpush3.msra.mxu0 %v234_v15 }
  0x28   :  { %501 = vmatprep.subr.mxu0 %v620_v0  ;;  %v343_v42 = vrot.slane %v327_v38, %v333_v29  ;;  %p576_p0 = pnand %p575_p13, %p569_p10 }
  0x29   :  { %502 = vmatpush3.msra.mxu0 %v233_v16 }
  0xe1   :  { %v142_v9 = vpop.f32.mrf.mxu0 }
  0xe2   :  { %v143_v10 = vadd.f32 %v454_v8, %v142_v9 }
  0xe3   :  { %v483_v11 = vpop.f32.mrf.mxu0 }
  0xe4   :  { %520 = vtanh.f32 %v143_v10 }
  0xf1   :  { %v521_v12 = vpop.eup %520 }
  0xf2   :  { %493 = vmatmul.mubr.msk.f32.vlgmr.msra.gmra.mxu1 %vm158_vm2, %v521_v12 }
  0xf3   :  { %508 = vmatprep.mubr.msk.f32.mxu1 %vm621_vm0, %v620_v0 }
 0x1b2   :  { %v228_v18 = vpop.f32.mrf.mxu1 }
 0x1b3   :  { %v229_v19 = vadd.f32 %v456_v17, %v228_v18 }
 0x1b4   :  { %v494_v20 = vpop.f32.mrf.mxu1 }
 0x1b5   :  { %522 = vtanh.f32 %v229_v19 }
 0x1b6   :  { %524 = vpow2.f32 %v320_v23 }
 0x1c2   :  { %v523_v21 = vpop.eup %522 }
 0x1c3   :  { %504 = vmatmul.mubr.msk.f32.vlgmr.msra.gmra.mxu0 %vm158_vm2, %v523_v21  ;;  %v525_v24 = vpop.eup %524 }
 0x1c4   :  { %v322_v25 = vadd.f32 1e-08, %v525_v24 }
 0x1c6   :  { %526 = vrcp.f32 %v322_v25 }
 0x1d3   :  { %v527_v30 = vpop.eup %526 }
 0x1d4   :  { %v334_v36 = vrot.slane %v527_v30, %v333_v29 }
 0x283   :  { %v313_v33 = vpop.f32.mrf.mxu0 }
 0x284   :  { %v314_v35 = vadd.f32 %v458_v31, %v313_v33 }
 0x285   :  { %v505_v37 = vpop.f32.mrf.mxu0 }
 0x286   :  { %v329_v39 = vsub.f32 %v328_v34, %v314_v35  ;;  %318 = vst.msk [vmem:[#allocation7] sm:$0xff] %vm317_vm3, %v314_v35 }
 0x288   :  { %v336_v40 = vmul.f32 %v334_v36, %v329_v39 }
 0x28a   :  { %v337_v41 = vmul.f32 %v336_v40, %v336_v40 }
 0x28c   :  { %v338_v43 = vmul.f32 -0.5, %v337_v41 }
 0x28e   :  { %v345_v44 = vadd.f32 %v343_v42, %v338_v43 }
 0x290   :  { %507 = vmatpush3.xpose.msk.msra.mxu1 %vm317_vm3, %v345_v44 }
 0x293   :  { %509 = vmatmul.mubr.msk.f32.vlgmr.msra.gmra.mxu1 %vm317_vm3, %v622_v45 }
 0x294   :  { %579 = shalt.err (!%p576_p0)
}
 0x295   :  { %433 = dma.vmem_to_hbm [thread:$0]  %s431_s7, 128, %s746_s9, [#allocation4]   ;;  %vm422_vm4 = vcmask 57344  }
 0x296   :  { %s624_s2 = smov [#allocation8]  }
 0x297   :  { %s440_s26 = sshll.u32 %s624_s2, 4  ;;  %s441_s26 = int_to_ptr.vmem [resolvable:$true] %s440_s26 }
 0x298   :  { %s588_s27 = scalar_lea.vmem %s441_s26, 16  ;;  %s592_s28 = scalar_lea.vmem %s441_s26, 32 }
 0x299   :  { %p589_p1 = scmp.ne.s32.totalorder %s441_s26, %s588_s27  ;;  %p593_p2 = scmp.lt.s32.totalorder %s441_s26, %s441_s26 }
 0x29a   :  { %p594_p3 = scmp.lt.s32.totalorder %s592_s28, %s588_s27 }
 0x29c   :  { %p595_p4 = por %p594_p3, %p593_p2 }
 0x29e   :  { %p596_p5 = pnand %p595_p4, %p589_p1 }
 0x353   :  { %v418_v46 = vpop.f32.mrf.mxu1 }
 0x354   :  { %423 = vst.msk [vmem:[#allocation8] sm:$0x1] %vm422_vm4, %v418_v46 }
 0x355   :  { %v510_v47 = vpop.f32.mrf.mxu1 }
 0x356   :  { %599 = shalt.err (!%p596_p5)
}
 0x357   :  { %443 = dma.vmem_to_hbm [thread:$0]  %s441_s26, 16, %s747_s10, [#allocation9]  }
 0x358   :  { %612 = dma.done.wait [#allocation4], 128  }
 0x359   :  { %613 = vsyncadd [#allocation4], 4294967168 }
 0x35a   :  { %614 = dma.done.wait [#allocation9], 16  }
 0x35b   :  { %615 = vsyncadd [#allocation9], 4294967280 }
 0x35c   :  { %450 = vsyncpa [#allocation3], 1 }
 0x35d   :  { %451 = vsyncpa [#allocation6], 1 }
 0x35e   :  { %452 = vsyncpa [#allocation4], 1 }
 0x35f   :  { %453 = vsyncpa [#allocation9], 1 }

</bundles_post_ra>
